<compile_context>
chip_gen: v6e
topology: v6e:2x2x1
jax: 0.10.0
libtpu: 0.0.40
codegen_flags: <defaults>
</compile_context>

<pallas_src>
import functools

import jax
import jax.numpy as jnp
from jax.experimental import pallas as pl
from jax.experimental.pallas import tpu as pltpu

_LANE = 128
_L0, _K1, _K2 = 14, 5, 3          # input length / conv kernel sizes
_L1 = _L0 - _K1 + 1               # 10
_L2 = _L1 - _K2 + 1               # 8
_CIN0 = 3
_KIN1 = _CIN0 * _L0               # 42  (conv1 flattened input features)
_KIN1_PAD = 48                    # padded to a multiple of 8
_F1 = 6 * _L1                     # 60  (conv1 flattened output features)
_F1_PAD = 64                      # padded to a multiple of 8
_F2 = 16 * _L2                    # 128 (conv2 flattened output == fc1 input)


def _round_up(x, m):
    return (x + m - 1) // m * m


# --------------------------------------------------------------------------- #
# Kernel: feature-major network over one batch tile (batch on lanes).
# --------------------------------------------------------------------------- #
def _cnn_kernel(x_ref, w1_ref, b1_ref, w2_ref, b2_ref,
                fc1w_ref, fc1b_ref, fc2w_ref, fc2b_ref, fc3w_ref, fc3b_ref,
                out_ref):
    cdt = w1_ref.dtype
    x = x_ref[...]                                                  # (48, TB)

    # conv1 (Toeplitz) + ReLU                                        (64, TB)
    a1 = jnp.maximum(
        jnp.dot(w1_ref[...], x, preferred_element_type=jnp.float32)
        + b1_ref[...], 0.0).astype(cdt)

    # conv2 (Toeplitz, rows already in PyTorch flatten order) + ReLU (128, TB)
    a2 = jnp.maximum(
        jnp.dot(w2_ref[...], a1, preferred_element_type=jnp.float32)
        + b2_ref[...], 0.0).astype(cdt)

    # fc1 + ReLU                                                     (64, TB)
    h1 = jnp.maximum(
        jnp.dot(fc1w_ref[...], a2, preferred_element_type=jnp.float32)
        + fc1b_ref[...], 0.0).astype(cdt)

    # fc2 + ReLU                                                     (32, TB)
    h2 = jnp.maximum(
        jnp.dot(fc2w_ref[...], h1, preferred_element_type=jnp.float32)
        + fc2b_ref[...], 0.0)

    # fc3 (32 -> 1): VPU multiply + sublane reduce -> lane-dense (1, TB) row.
    out_ref[...] = (jnp.sum(h2 * fc3w_ref[...], axis=0, keepdims=True)
                    + fc3b_ref[...])


# --------------------------------------------------------------------------- #
# One-time weight re-layout (run once per parameter set, OUTSIDE the hot path).
# --------------------------------------------------------------------------- #
def _conv1d_toeplitz_fm(w, l_in):
    """Feature-major Toeplitz for a valid stride-1 conv1d.

    w: (C_out, C_in, K).  Returns T of shape (C_out*L_out, C_in*L_in) with
      T[co*L_out + l, ci*L_in + l + k] = w[co, ci, k]
    so that y_fm = T @ x_fm with channel-major flattened feature axes.
    """
    c_out, c_in, k = w.shape
    l_out = l_in - k + 1
    co, ci, kk, ll = jnp.meshgrid(jnp.arange(c_out), jnp.arange(c_in),
                                  jnp.arange(k), jnp.arange(l_out),
                                  indexing="ij")
    rows = (co * l_out + ll).reshape(-1)
    cols = (ci * l_in + ll + kk).reshape(-1)
    vals = jnp.broadcast_to(w[:, :, :, None].astype(jnp.float32),
                            (c_out, c_in, k, l_out)).reshape(-1)
    t = jnp.zeros((c_out * l_out, c_in * l_in), jnp.float32)
    return t.at[rows, cols].set(vals)


def prepare_indicator_cnn_params(params, compute_dtype=jnp.float32):
    """Build the feature-major, padded, (optionally bf16) weight set once."""
    w1 = _conv1d_toeplitz_fm(params["w1"], _L0)                      # (60, 42)
    w1 = jnp.pad(w1, ((0, _F1_PAD - _F1), (0, _KIN1_PAD - _KIN1)))   # (64, 48)
    w2 = _conv1d_toeplitz_fm(params["w2"], _L1)                      # (128, 60)
    w2 = jnp.pad(w2, ((0, 0), (0, _F1_PAD - _F1)))                   # (128, 64)
    b1 = jnp.pad(jnp.repeat(params["b1"].astype(jnp.float32), _L1),
                 (0, _F1_PAD - _F1)).reshape(-1, 1)                  # (64, 1)
    b2 = jnp.repeat(params["b2"].astype(jnp.float32), _L2).reshape(-1, 1)  # (128,1)
    return {
        "w1": w1.astype(compute_dtype),
        "b1": b1,
        "w2": w2.astype(compute_dtype),
        "b2": b2,
        "fc1w": params["fc1_w"].astype(compute_dtype),               # (64, 128)
        "fc1b": params["fc1_b"].astype(jnp.float32).reshape(-1, 1),
        "fc2w": params["fc2_w"].astype(compute_dtype),               # (32, 64)
        "fc2b": params["fc2_b"].astype(jnp.float32).reshape(-1, 1),
        "fc3w": params["fc3_w"].astype(jnp.float32).reshape(-1, 1),  # (32, 1)
        "fc3b": params["fc3_b"].astype(jnp.float32).reshape(1, 1),
    }


# --------------------------------------------------------------------------- #
# Forward: batch-tiled pallas_call (hot path).
# --------------------------------------------------------------------------- #
@functools.partial(jax.jit, static_argnames=("batch_tile",))
def indicator_cnn_forward(x_ncw, prepared, *, batch_tile=1024):
    """x_ncw: (B, 3, 14) float32; prepared: output of prepare_indicator_cnn_params."""
    B = x_ncw.shape[0]
    cdt = prepared["w1"].dtype

    # Batch tile sits on the lane axis -> multiple of 128.  Keep >= 2 grid
    # steps when the padded batch allows it (v7x has 2 TensorCores).
    B_ceil = _round_up(B, _LANE)
    TB = min(_round_up(batch_tile, _LANE), B_ceil)
    if B_ceil >= 2 * _LANE:
        TB = min(TB, _round_up(B_ceil // 2, _LANE))
    B_pad = _round_up(B_ceil, TB)
    n_tiles = B_pad // TB

    # NCW row-major reshape == channel-major flatten; pad features 42->48 and
    # batch B->B_pad with zeros; transpose to feature-major (48, B_pad).
    x_flat = x_ncw.reshape(B, _KIN1).astype(cdt)
    x_flat = jnp.pad(x_flat, ((0, B_pad - B), (0, _KIN1_PAD - _KIN1)))
    xT = x_flat.T                                                    # (48, B_pad)

    weights = (prepared["w1"], prepared["b1"], prepared["w2"], prepared["b2"],
               prepared["fc1w"], prepared["fc1b"], prepared["fc2w"],
               prepared["fc2b"], prepared["fc3w"], prepared["fc3b"])
    # Weights: full-array blocks, same block every step -> stay VMEM-resident.
    weight_specs = [pl.BlockSpec(w.shape, lambda i: (0, 0)) for w in weights]

    grid_spec = pltpu.PrefetchScalarGridSpec(
        num_scalar_prefetch=0,
        grid=(n_tiles,),
        in_specs=[pl.BlockSpec((_KIN1_PAD, TB), lambda i: (0, i))] + weight_specs,
        out_specs=pl.BlockSpec((1, TB), lambda i: (0, i)),           # lane-dense
    )

    out = pl.pallas_call(
        _cnn_kernel,
        out_shape=jax.ShapeDtypeStruct((1, B_pad), jnp.float32),
        grid_spec=grid_spec,
        compiler_params=pltpu.CompilerParams(
            dimension_semantics=("parallel",)),   # 2 TCs on v7x; no-op elsewhere
    )(xT, *weights)
    return out[0, :B].reshape(B, 1)


# --------------------------------------------------------------------------- #
# Pure-JAX reference matching the PyTorch forward exactly (NCW).
# --------------------------------------------------------------------------- #
def reference_forward(x, p):
    def conv1d(x, w, b):
        K = w.shape[2]
        Lout = x.shape[2] - K + 1
        acc = jnp.zeros((x.shape[0], w.shape[0], Lout), jnp.float32)
        for k in range(K):
            acc = acc + jnp.einsum("bcl,oc->bol", x[:, :, k:k + Lout], w[:, :, k])
        return acc + b[None, :, None]

    a1 = jax.nn.relu(conv1d(x, p["w1"], p["b1"]))
    a2 = jax.nn.relu(conv1d(a1, p["w2"], p["b2"]))
    flat = a2.reshape(a2.shape[0], -1)            # channel-major flatten
    h1 = jax.nn.relu(flat @ p["fc1_w"].T + p["fc1_b"])
    h2 = jax.nn.relu(h1 @ p["fc2_w"].T + p["fc2_b"])
    return h2 @ p["fc3_w"].T + p["fc3_b"]


if __name__ == "__main__":
    key = jax.random.PRNGKey(0)
    ks = jax.random.split(key, 12)

    B, C_in, L = 2, 3, 14            # L=14 so that flatten = 16*8 = 128
    x = jax.random.normal(ks[0], (B, C_in, L), jnp.float32)

    def init(k, shape, scale):
        return scale * jax.random.normal(k, shape, jnp.float32)

    params = {
        "w1": init(ks[1], (6, 3, 5), 0.25),
        "b1": init(ks[2], (6,), 0.1),
        "w2": init(ks[3], (16, 6, 3), 0.25),
        "b2": init(ks[4], (16,), 0.1),
        "fc1_w": init(ks[5], (64, 128), 0.1),
        "fc1_b": init(ks[6], (64,), 0.1),
        "fc2_w": init(ks[7], (32, 64), 0.1),
        "fc2_b": init(ks[8], (32,), 0.1),
        "fc3_w": init(ks[9], (1, 32), 0.1),
        "fc3_b": init(ks[10], (1,), 0.1),
    }

    # ---- f32 parity path (exact match with the PyTorch module) --------------
    prep_f32 = prepare_indicator_cnn_params(params, compute_dtype=jnp.float32)
    y = indicator_cnn_forward(x, prep_f32)
    jax.block_until_ready(y)
    y_ref = reference_forward(x, params)
    assert y.shape == (B, 1), y.shape
    err = float(jnp.max(jnp.abs(y - y_ref)))
    assert err < 2e-4, f"f32 mismatch vs reference: {err}"

    # ---- multi-tile grid path (B=300, batch_tile=128 -> 3 grid steps) -------
    B2 = 300
    x2 = jax.random.normal(ks[11], (B2, C_in, L), jnp.float32)
    y2 = indicator_cnn_forward(x2, prep_f32, batch_tile=128)
    jax.block_until_ready(y2)
    y2_ref = reference_forward(x2, params)
    assert y2.shape == (B2, 1), y2.shape
    err2 = float(jnp.max(jnp.abs(y2 - y2_ref)))
    assert err2 < 2e-4, f"f32 mismatch vs reference (multi-tile): {err2}"

    # ---- bf16 fast path (MXU-native operands, f32 accumulation) -------------
    prep_bf16 = prepare_indicator_cnn_params(params, compute_dtype=jnp.bfloat16)
    y3 = indicator_cnn_forward(x2, prep_bf16)
    jax.block_until_ready(y3)
    err3 = float(jnp.max(jnp.abs(y3 - y2_ref)))
    assert y3.shape == (B2, 1), y3.shape
    assert err3 < 1e-1, f"bf16 path too far from f32 reference: {err3}"

    print("KERNEL_OK")
</pallas_src>

<mosaic_0001>
module attributes {stable_mosaic.version = 11 : i64} {
  func.func @_cnn_kernel(%arg0: i32, %arg1: memref<48x128xf32, #tpu.memory_space<vmem>>, %arg2: memref<64x48xf32, #tpu.memory_space<vmem>>, %arg3: memref<64x1xf32, #tpu.memory_space<vmem>>, %arg4: memref<128x64xf32, #tpu.memory_space<vmem>>, %arg5: memref<128x1xf32, #tpu.memory_space<vmem>>, %arg6: memref<64x128xf32, #tpu.memory_space<vmem>>, %arg7: memref<64x1xf32, #tpu.memory_space<vmem>>, %arg8: memref<32x64xf32, #tpu.memory_space<vmem>>, %arg9: memref<32x1xf32, #tpu.memory_space<vmem>>, %arg10: memref<32x1xf32, #tpu.memory_space<vmem>>, %arg11: memref<1x1xf32, #tpu.memory_space<vmem>>, %arg12: memref<1x128xf32, #tpu.memory_space<vmem>>) attributes {dimension_semantics = [#tpu.dimension_semantics<parallel>], iteration_bounds = array<i64: 1>, scalar_prefetch = 0 : i64, scratch_operands = 0 : i64, tpu.core_type = #tpu.core_type<tc>, window_params = [{transform_indices = @transform_0, window_bounds = array<i64: 48, 128>}, {pipeline_mode = #tpu.pipeline_mode<synchronous>, transform_indices = @transform_1, window_bounds = array<i64: 64, 48>}, {pipeline_mode = #tpu.pipeline_mode<synchronous>, transform_indices = @transform_2, window_bounds = array<i64: 64, 1>}, {pipeline_mode = #tpu.pipeline_mode<synchronous>, transform_indices = @transform_3, window_bounds = array<i64: 128, 64>}, {pipeline_mode = #tpu.pipeline_mode<synchronous>, transform_indices = @transform_4, window_bounds = array<i64: 128, 1>}, {pipeline_mode = #tpu.pipeline_mode<synchronous>, transform_indices = @transform_5, window_bounds = array<i64: 64, 128>}, {pipeline_mode = #tpu.pipeline_mode<synchronous>, transform_indices = @transform_6, window_bounds = array<i64: 64, 1>}, {pipeline_mode = #tpu.pipeline_mode<synchronous>, transform_indices = @transform_7, window_bounds = array<i64: 32, 64>}, {pipeline_mode = #tpu.pipeline_mode<synchronous>, transform_indices = @transform_8, window_bounds = array<i64: 32, 1>}, {pipeline_mode = #tpu.pipeline_mode<synchronous>, transform_indices = @transform_9, window_bounds = array<i64: 32, 1>}, {pipeline_mode = #tpu.pipeline_mode<synchronous>, transform_indices = @transform_10, window_bounds = array<i64: 1, 1>}, {transform_indices = @transform_11, window_bounds = array<i64: 1, 128>}]} {
    %c0 = arith.constant 0 : index
    %c0_0 = arith.constant 0 : index
    %0 = vector.load %arg1[%c0, %c0_0] : memref<48x128xf32, #tpu.memory_space<vmem>>, vector<48x128xf32>
    %c0_1 = arith.constant 0 : index
    %c0_2 = arith.constant 0 : index
    %1 = vector.load %arg2[%c0_1, %c0_2] : memref<64x48xf32, #tpu.memory_space<vmem>>, vector<64x48xf32>
    %cst = arith.constant dense<0.000000e+00> : vector<64x128xf32>
    %2 = tpu.matmul %1, %0, %cst {dimension_numbers = #tpu.dot_dimension_numbers<[1], [0], [0], [1], [0, 0, 1, 1], [], []>} : vector<64x48xf32>, vector<48x128xf32>, vector<64x128xf32> -> vector<64x128xf32>
    %c0_3 = arith.constant 0 : index
    %c0_4 = arith.constant 0 : index
    %3 = vector.load %arg3[%c0_3, %c0_4] : memref<64x1xf32, #tpu.memory_space<vmem>>, vector<64x1xf32>
    %4 = vector.broadcast %3 : vector<64x1xf32> to vector<64x128xf32>
    %5 = arith.addf %2, %4 : vector<64x128xf32>
    %cst_5 = arith.constant 0.000000e+00 : f32
    %6 = vector.broadcast %cst_5 : f32 to vector<64x128xf32>
    %7 = arith.maximumf %5, %6 : vector<64x128xf32>
    %c0_6 = arith.constant 0 : index
    %c0_7 = arith.constant 0 : index
    %8 = vector.load %arg4[%c0_6, %c0_7] : memref<128x64xf32, #tpu.memory_space<vmem>>, vector<128x64xf32>
    %cst_8 = arith.constant dense<0.000000e+00> : vector<128x128xf32>
    %9 = tpu.matmul %8, %7, %cst_8 {dimension_numbers = #tpu.dot_dimension_numbers<[1], [0], [0], [1], [0, 0, 1, 1], [], []>} : vector<128x64xf32>, vector<64x128xf32>, vector<128x128xf32> -> vector<128x128xf32>
    %c0_9 = arith.constant 0 : index
    %c0_10 = arith.constant 0 : index
    %10 = vector.load %arg5[%c0_9, %c0_10] : memref<128x1xf32, #tpu.memory_space<vmem>>, vector<128x1xf32>
    %11 = vector.broadcast %10 : vector<128x1xf32> to vector<128x128xf32>
    %12 = arith.addf %9, %11 : vector<128x128xf32>
    %cst_11 = arith.constant 0.000000e+00 : f32
    %13 = vector.broadcast %cst_11 : f32 to vector<128x128xf32>
    %14 = arith.maximumf %12, %13 : vector<128x128xf32>
    %c0_12 = arith.constant 0 : index
    %c0_13 = arith.constant 0 : index
    %15 = vector.load %arg6[%c0_12, %c0_13] : memref<64x128xf32, #tpu.memory_space<vmem>>, vector<64x128xf32>
    %cst_14 = arith.constant dense<0.000000e+00> : vector<64x128xf32>
    %16 = tpu.matmul %15, %14, %cst_14 {dimension_numbers = #tpu.dot_dimension_numbers<[1], [0], [0], [1], [0, 0, 1, 1], [], []>} : vector<64x128xf32>, vector<128x128xf32>, vector<64x128xf32> -> vector<64x128xf32>
    %c0_15 = arith.constant 0 : index
    %c0_16 = arith.constant 0 : index
    %17 = vector.load %arg7[%c0_15, %c0_16] : memref<64x1xf32, #tpu.memory_space<vmem>>, vector<64x1xf32>
    %18 = vector.broadcast %17 : vector<64x1xf32> to vector<64x128xf32>
    %19 = arith.addf %16, %18 : vector<64x128xf32>
    %cst_17 = arith.constant 0.000000e+00 : f32
    %20 = vector.broadcast %cst_17 : f32 to vector<64x128xf32>
    %21 = arith.maximumf %19, %20 : vector<64x128xf32>
    %c0_18 = arith.constant 0 : index
    %c0_19 = arith.constant 0 : index
    %22 = vector.load %arg8[%c0_18, %c0_19] : memref<32x64xf32, #tpu.memory_space<vmem>>, vector<32x64xf32>
    %cst_20 = arith.constant dense<0.000000e+00> : vector<32x128xf32>
    %23 = tpu.matmul %22, %21, %cst_20 {dimension_numbers = #tpu.dot_dimension_numbers<[1], [0], [0], [1], [0, 0, 1, 1], [], []>} : vector<32x64xf32>, vector<64x128xf32>, vector<32x128xf32> -> vector<32x128xf32>
    %c0_21 = arith.constant 0 : index
    %c0_22 = arith.constant 0 : index
    %24 = vector.load %arg9[%c0_21, %c0_22] : memref<32x1xf32, #tpu.memory_space<vmem>>, vector<32x1xf32>
    %25 = vector.broadcast %24 : vector<32x1xf32> to vector<32x128xf32>
    %26 = arith.addf %23, %25 : vector<32x128xf32>
    %cst_23 = arith.constant 0.000000e+00 : f32
    %27 = vector.broadcast %cst_23 : f32 to vector<32x128xf32>
    %28 = arith.maximumf %26, %27 : vector<32x128xf32>
    %c0_24 = arith.constant 0 : index
    %c0_25 = arith.constant 0 : index
    %29 = vector.load %arg10[%c0_24, %c0_25] : memref<32x1xf32, #tpu.memory_space<vmem>>, vector<32x1xf32>
    %30 = vector.broadcast %29 : vector<32x1xf32> to vector<32x128xf32>
    %31 = arith.mulf %28, %30 : vector<32x128xf32>
    %cst_26 = arith.constant dense<0.000000e+00> : vector<128xf32>
    %32 = vector.multi_reduction <add>, %31, %cst_26 [0] : vector<32x128xf32> to vector<128xf32>
    %33 = vector.shape_cast %32 : vector<128xf32> to vector<1x128xf32>
    %c0_27 = arith.constant 0 : index
    %c0_28 = arith.constant 0 : index
    %34 = vector.load %arg11[%c0_27, %c0_28] : memref<1x1xf32, #tpu.memory_space<vmem>>, vector<1x1xf32>
    %35 = vector.broadcast %34 : vector<1x1xf32> to vector<1x128xf32>
    %36 = arith.addf %33, %35 : vector<1x128xf32>
    %c0_29 = arith.constant 0 : index
    %c0_30 = arith.constant 0 : index
    %37 = vector.load %arg12[%c0_29, %c0_30] : memref<1x128xf32, #tpu.memory_space<vmem>>, vector<1x128xf32>
    tpu.vector_store %arg12[%c0_29, %c0_30], %36 {strides = array<i32>} : memref<1x128xf32, #tpu.memory_space<vmem>>, vector<1x128xf32>,
    return
  }
  func.func @transform_0(%arg0: i32) -> (i32, i32) {
    %c0_i32 = arith.constant 0 : i32
    %c0_i32_0 = arith.constant 0 : i32
    return %c0_i32, %arg0 : i32, i32
  }
  func.func @transform_1(%arg0: i32) -> (i32, i32) {
    %c0_i32 = arith.constant 0 : i32
    %c0_i32_0 = arith.constant 0 : i32
    %c0_i32_1 = arith.constant 0 : i32
    return %c0_i32, %c0_i32_0 : i32, i32
  }
  func.func @transform_2(%arg0: i32) -> (i32, i32) {
    %c0_i32 = arith.constant 0 : i32
    %c0_i32_0 = arith.constant 0 : i32
    %c0_i32_1 = arith.constant 0 : i32
    return %c0_i32, %c0_i32_0 : i32, i32
  }
  func.func @transform_3(%arg0: i32) -> (i32, i32) {
    %c0_i32 = arith.constant 0 : i32
    %c0_i32_0 = arith.constant 0 : i32
    %c0_i32_1 = arith.constant 0 : i32
    return %c0_i32, %c0_i32_0 : i32, i32
  }
  func.func @transform_4(%arg0: i32) -> (i32, i32) {
    %c0_i32 = arith.constant 0 : i32
    %c0_i32_0 = arith.constant 0 : i32
    %c0_i32_1 = arith.constant 0 : i32
    return %c0_i32, %c0_i32_0 : i32, i32
  }
  func.func @transform_5(%arg0: i32) -> (i32, i32) {
    %c0_i32 = arith.constant 0 : i32
    %c0_i32_0 = arith.constant 0 : i32
    %c0_i32_1 = arith.constant 0 : i32
    return %c0_i32, %c0_i32_0 : i32, i32
  }
  func.func @transform_6(%arg0: i32) -> (i32, i32) {
    %c0_i32 = arith.constant 0 : i32
    %c0_i32_0 = arith.constant 0 : i32
    %c0_i32_1 = arith.constant 0 : i32
    return %c0_i32, %c0_i32_0 : i32, i32
  }
  func.func @transform_7(%arg0: i32) -> (i32, i32) {
    %c0_i32 = arith.constant 0 : i32
    %c0_i32_0 = arith.constant 0 : i32
    %c0_i32_1 = arith.constant 0 : i32
    return %c0_i32, %c0_i32_0 : i32, i32
  }
  func.func @transform_8(%arg0: i32) -> (i32, i32) {
    %c0_i32 = arith.constant 0 : i32
    %c0_i32_0 = arith.constant 0 : i32
    %c0_i32_1 = arith.constant 0 : i32
    return %c0_i32, %c0_i32_0 : i32, i32
  }
  func.func @transform_9(%arg0: i32) -> (i32, i32) {
    %c0_i32 = arith.constant 0 : i32
    %c0_i32_0 = arith.constant 0 : i32
    %c0_i32_1 = arith.constant 0 : i32
    return %c0_i32, %c0_i32_0 : i32, i32
  }
  func.func @transform_10(%arg0: i32) -> (i32, i32) {
    %c0_i32 = arith.constant 0 : i32
    %c0_i32_0 = arith.constant 0 : i32
    %c0_i32_1 = arith.constant 0 : i32
    return %c0_i32, %c0_i32_0 : i32, i32
  }
  func.func @transform_11(%arg0: i32) -> (i32, i32) {
    %c0_i32 = arith.constant 0 : i32
    %c0_i32_0 = arith.constant 0 : i32
    return %c0_i32, %arg0 : i32, i32
  }
}

</mosaic_0001>

<bundles_post_ra>
// kernel: indicator_cnn_forward.1
= control target key start
LH: loop header
LB: loop body
LE: loop exit
PB: predicated region body
PF: predicated region fallthrough
CT: control target
= control target key end

     0   :  { %v1148_v2 = vmov 0   ;;  %vm102_vm0 = vcmask 392192   ;;  %vm352_vm1 = vcmask 523264   ;;  %s1501_s0 = inlined_call_operand.vmem [shape: f32[48,128], index: 0, kind: input, shape index: {}]   ;;  %s1502_s2 = inlined_call_operand.vmem [shape: f32[64,1], index: 2, kind: input, shape index: {}]   ;;  %s1503_s1 = inlined_call_operand.vmem [shape: f32[64,48], index: 1, kind: input, shape index: {}]   ;;  %s1504_s10 = inlined_call_operand.<no memory space> [shape: f32[1,1], index: 10, kind: input, shape index: {}]   ;;  %s1505_s4 = inlined_call_operand.vmem [shape: f32[128,1], index: 4, kind: input, shape index: {}]   ;;  %s1506_s6 = inlined_call_operand.vmem [shape: f32[64,1], index: 6, kind: input, shape index: {}]   ;;  %s1507_s8 = inlined_call_operand.vmem [shape: f32[32,1], index: 8, kind: input, shape index: {}]   ;;  %s1508_s9 = inlined_call_operand.vmem [shape: f32[32,1], index: 9, kind: input, shape index: {}]   ;;  %s1509_s3 = inlined_call_operand.vmem [shape: f32[128,64], index: 3, kind: input, shape index: {}]   ;;  %s1510_s5 = inlined_call_operand.vmem [shape: f32[64,128], index: 5, kind: input, shape index: {}]   ;;  %s1511_s7 = inlined_call_operand.vmem [shape: f32[32,64], index: 7, kind: input, shape index: {}]   ;;  %s1512_s11 = inlined_call_operand.vmem [shape: f32[1,128], index: 11, kind: output, shape index: {}]  }
   0x1   :  { %v45_v0 = vld [vmem:[%s1501_s0 + $0x28] sm:$0xff]  ;;  %v44_v1 = vld [vmem:[%s1501_s0 + $0x20] sm:$0xff]  ;;  %1146 = vset.pattern.permute.xlu0 %v1148_v2  ;;  %1147 = vset.pattern.permute.xlu1 %v1148_v2  ;;  %v16_v3 = vstv %s1504_s10  ;;  %v43_v4 = vld [vmem:[%s1501_s0 + $0x18] sm:$0xff] }
   0x2   :  { %1015 = vmatprep.subr.mxu0 %v45_v0  ;;  %17 = vst [vmem:[#allocation2] sm:$0x1] %v16_v3  ;;  %v61_v5 = vld [vmem:[%s1502_s2 + $0x38] sm:$0xff]  ;;  %v46_v6 = vld [vmem:[%s1503_s1] sm:$0xff]  ;;  %v42_v7 = vld [vmem:[%s1501_s0 + $0x10] sm:$0xff] }
   0x3   :  { %1016 = vmatpush3.msra.mxu0 %v45_v0  ;;  %99 = vperm.xlu0 %1146, %v61_v5   ;;  %v60_v8 = vld [vmem:[%s1502_s2 + $0x30] sm:$0xff]  ;;  %v59_v9 = vld [vmem:[%s1502_s2 + $0x28] sm:$0xff]  ;;  %v58_v11 = vld [vmem:[%s1502_s2 + $0x20] sm:$0xff] }
   0x4   :  { %1017 = vmatprep.subr.mxu0 %v44_v1  ;;  %1027 = vmatprep.mubr.msk.f32.mxu0 %vm102_vm0, %v46_v6  ;;  %v41_v10 = vld [vmem:[%s1501_s0 + $0x8] sm:$0xff]  ;;  %v40_v12 = vld [vmem:[%s1501_s0] sm:$0xff]  ;;  %v57_v13 = vld [vmem:[%s1502_s2 + $0x18] sm:$0xff] }
   0x5   :  { %1018 = vmatpush3.msra.mxu0 %v44_v1  ;;  %89 = vperm.xlu1 %1147, %v59_v9   ;;  %v47_v14 = vld [vmem:[%s1503_s1 + $0x8] sm:$0xff]  ;;  %v56_v15 = vld [vmem:[%s1502_s2 + $0x10] sm:$0xff]  ;;  %v49_v18 = vld [vmem:[%s1503_s1 + $0x18] sm:$0xff] }
   0x6   :  { %1019 = vmatprep.subr.mxu0 %v43_v4  ;;  %v48_v16 = vld [vmem:[%s1503_s1 + $0x10] sm:$0xff]  ;;  %v55_v17 = vld [vmem:[%s1502_s2 + $0x8] sm:$0xff]  ;;  %v54_v19 = vld [vmem:[%s1502_s2] sm:$0xff] }
   0x7   :  { %1020 = vmatpush3.msra.mxu0 %v43_v4  ;;  %94 = vperm.xlu0 %1146, %v60_v8   ;;  %v50_v20 = vld [vmem:[%s1503_s1 + $0x20] sm:$0xff]  ;;  %v271_v21 = vld [vmem:[%s1505_s4 + $0x78] sm:$0xff]  ;;  %v51_v22 = vld [vmem:[%s1503_s1 + $0x28] sm:$0xff] }
   0x8   :  { %1021 = vmatprep.subr.mxu0 %v42_v7  ;;  %v270_v23 = vld [vmem:[%s1505_s4 + $0x70] sm:$0xff]  ;;  %v269_v25 = vld [vmem:[%s1505_s4 + $0x68] sm:$0xff]  ;;  %v53_v26 = vld [vmem:[%s1503_s1 + $0x38] sm:$0xff] }
   0x9   :  { %1022 = vmatpush3.msra.mxu0 %v42_v7  ;;  %84 = vperm.xlu1 %1147, %v58_v11   ;;  %v52_v24 = vld [vmem:[%s1503_s1 + $0x30] sm:$0xff]  ;;  %v268_v27 = vld [vmem:[%s1505_s4 + $0x60] sm:$0xff]  ;;  %v267_v28 = vld [vmem:[%s1505_s4 + $0x58] sm:$0xff] }
   0xa   :  { %1023 = vmatprep.subr.mxu0 %v41_v10  ;;  %v266_v29 = vld [vmem:[%s1505_s4 + $0x50] sm:$0xff]  ;;  %v265_v30 = vld [vmem:[%s1505_s4 + $0x48] sm:$0xff]  ;;  %v264_v31 = vld [vmem:[%s1505_s4 + $0x40] sm:$0xff] }
   0xb   :  { %1024 = vmatpush3.msra.mxu0 %v41_v10  ;;  %79 = vperm.xlu0 %1146, %v57_v13   ;;  %v263_v32 = vld [vmem:[%s1505_s4 + $0x38] sm:$0xff]  ;;  %v262_v33 = vld [vmem:[%s1505_s4 + $0x30] sm:$0xff]  ;;  %v261_v34 = vld [vmem:[%s1505_s4 + $0x28] sm:$0xff] }
   0xc   :  { %1025 = vmatprep.subr.mxu0 %v40_v12  ;;  %v260_v35 = vld [vmem:[%s1505_s4 + $0x20] sm:$0xff]  ;;  %v259_v36 = vld [vmem:[%s1505_s4 + $0x18] sm:$0xff]  ;;  %v258_v37 = vld [vmem:[%s1505_s4 + $0x10] sm:$0xff] }
   0xd   :  { %1026 = vmatpush3.msra.mxu0 %v40_v12  ;;  %74 = vperm.xlu1 %1147, %v56_v15   ;;  %v257_v38 = vld [vmem:[%s1505_s4 + $0x8] sm:$0xff]  ;;  %v256_v39 = vld [vmem:[%s1505_s4] sm:$0xff]  ;;  %v577_v40 = vld [vmem:[%s1506_s6 + $0x38] sm:$0xff] }
   0xe   :  { %1028 = vmatmul.mubr.msk.f32.vlgmr.msra.gmra.mxu0 %vm102_vm0, %v47_v14  ;;  %v576_v41 = vld [vmem:[%s1506_s6 + $0x30] sm:$0xff]  ;;  %v575_v42 = vld [vmem:[%s1506_s6 + $0x28] sm:$0xff]  ;;  %v574_v43 = vld [vmem:[%s1506_s6 + $0x20] sm:$0xff] }
   0xf   :  { %1030 = vmatprep.mubr.msk.f32.mxu0 %vm102_vm0, %v48_v16  ;;  %69 = vperm.xlu0 %1146, %v55_v17   ;;  %v573_v44 = vld [vmem:[%s1506_s6 + $0x18] sm:$0xff]  ;;  %v572_v45 = vld [vmem:[%s1506_s6 + $0x10] sm:$0xff]  ;;  %v571_v46 = vld [vmem:[%s1506_s6 + $0x8] sm:$0xff] }
  0x10   :  { %v570_v47 = vld [vmem:[%s1506_s6] sm:$0xff]  ;;  %v736_v49 = vld [vmem:[%s1507_s8 + $0x8] sm:$0xff]  ;;  %v737_v50 = vld [vmem:[%s1507_s8 + $0x10] sm:$0xff] }
  0x11   :  { %64 = vperm.xlu1 %1147, %v54_v19   ;;  %v735_v48 = vld [vmem:[%s1507_s8] sm:$0xff]  ;;  %v738_v51 = vld [vmem:[%s1507_s8 + $0x18] sm:$0xff]  ;;  %v861_v53 = vld [vmem:[%s1508_s9 + $0x8] sm:$0xff] }
  0x12   :  { %1031 = vmatmul.mubr.msk.f32.gmra.mxu0 %vm102_vm0, %v49_v18  ;;  %v860_v52 = vld [vmem:[%s1508_s9] sm:$0xff]  ;;  %v862_v54 = vld [vmem:[%s1508_s9 + $0x10] sm:$0xff]  ;;  %v863_v55 = vld [vmem:[%s1508_s9 + $0x18] sm:$0xff] }
  0x13   :  { %1033 = vmatprep.mubr.msk.f32.mxu0 %vm102_vm0, %v50_v20  ;;  %349 = vperm.xlu0 %1146, %v271_v21   ;;  %v897_v56 = vld [vmem:[#allocation2] sm:$0x1] }
  0x14   :  { %v240_v57 = vld [vmem:[%s1509_s3] sm:$0xff] }
  0x15   :  { %344 = vperm.xlu1 %1147, %v270_v23   ;;  %1055 = vmatprep.mubr.msk.f32.mxu1 %vm352_vm1, %v240_v57 }
  0x16   :  { %1034 = vmatmul.mubr.msk.f32.gmra.mxu0 %vm102_vm0, %v51_v22 }
  0x17   :  { %1036 = vmatprep.mubr.msk.f32.mxu0 %vm102_vm0, %v52_v24  ;;  %339 = vperm.xlu0 %1146, %v269_v25  }
  0x19   :  { %334 = vperm.xlu1 %1147, %v268_v27   ;;  %v242_v27 = vld [vmem:[%s1509_s3 + $0x10] sm:$0xff] }
  0x1a   :  { %1037 = vmatmul.mubr.msk.f32.gmra.mxu0 %vm102_vm0, %v53_v26  ;;  %v241_v26 = vld [vmem:[%s1509_s3 + $0x8] sm:$0xff] }
  0x1b   :  { %329 = vperm.xlu0 %1146, %v267_v28   ;;  %v243_v28 = vld [vmem:[%s1509_s3 + $0x18] sm:$0xff] }
  0x1d   :  { %324 = vperm.xlu1 %1147, %v266_v29   ;;  %v244_v29 = vld [vmem:[%s1509_s3 + $0x20] sm:$0xff] }
  0x1f   :  { %319 = vperm.xlu0 %1146, %v265_v30   ;;  %v245_v30 = vld [vmem:[%s1509_s3 + $0x28] sm:$0xff] }
  0x21   :  { %314 = vperm.xlu1 %1147, %v264_v31   ;;  %v246_v31 = vld [vmem:[%s1509_s3 + $0x30] sm:$0xff] }
  0x23   :  { %309 = vperm.xlu0 %1146, %v263_v32   ;;  %v247_v32 = vld [vmem:[%s1509_s3 + $0x38] sm:$0xff] }
  0x25   :  { %304 = vperm.xlu1 %1147, %v262_v33   ;;  %v248_v33 = vld [vmem:[%s1509_s3 + $0x40] sm:$0xff] }
  0x27   :  { %299 = vperm.xlu0 %1146, %v261_v34   ;;  %v249_v34 = vld [vmem:[%s1509_s3 + $0x48] sm:$0xff] }
  0x29   :  { %294 = vperm.xlu1 %1147, %v260_v35   ;;  %v250_v35 = vld [vmem:[%s1509_s3 + $0x50] sm:$0xff] }
  0x2b   :  { %289 = vperm.xlu0 %1146, %v259_v36   ;;  %v251_v36 = vld [vmem:[%s1509_s3 + $0x58] sm:$0xff] }
  0x2d   :  { %284 = vperm.xlu1 %1147, %v258_v37   ;;  %v252_v37 = vld [vmem:[%s1509_s3 + $0x60] sm:$0xff] }
  0x2f   :  { %279 = vperm.xlu0 %1146, %v257_v38   ;;  %v253_v38 = vld [vmem:[%s1509_s3 + $0x68] sm:$0xff] }
  0x31   :  { %274 = vperm.xlu1 %1147, %v256_v39   ;;  %v254_v39 = vld [vmem:[%s1509_s3 + $0x70] sm:$0xff] }
  0x33   :  { %615 = vperm.xlu0 %1146, %v577_v40   ;;  %v255_v40 = vld [vmem:[%s1509_s3 + $0x78] sm:$0xff] }
  0x35   :  { %610 = vperm.xlu1 %1147, %v576_v41   ;;  %v562_v41 = vld [vmem:[%s1510_s5] sm:$0xff] }
  0x36   :  { %1111 = vmatprep.mubr.f32.mxu0 %v562_v41 }
  0x37   :  { %605 = vperm.xlu0 %1146, %v575_v42  }
  0x39   :  { %600 = vperm.xlu1 %1147, %v574_v43  }
  0x3b   :  { %595 = vperm.xlu0 %1146, %v573_v44  }
  0x3d   :  { %590 = vperm.xlu1 %1147, %v572_v45  }
  0x3f   :  { %585 = vperm.xlu0 %1146, %v571_v46  }
  0x41   :  { %580 = vperm.xlu1 %1147, %v570_v47  }
  0x43   :  { %741 = vperm.xlu0 %1146, %v735_v48  }
  0x45   :  { %746 = vperm.xlu1 %1147, %v736_v49  }
  0x47   :  { %751 = vperm.xlu0 %1146, %v737_v50  }
  0x49   :  { %756 = vperm.xlu1 %1147, %v738_v51  }
  0x4b   :  { %866 = vperm.xlu0 %1146, %v860_v52  }
  0x4d   :  { %871 = vperm.xlu1 %1147, %v861_v53  }
  0x4f   :  { %876 = vperm.xlu0 %1146, %v862_v54  }
  0x51   :  { %881 = vperm.xlu1 %1147, %v863_v55  }
  0x53   :  { %900 = vperm.xlu0 %1146, %v897_v56  }
  0x7e   :  { %v100_v60 = vpop.permute.xlu0 %99 }
  0x80   :  { %v90_v62 = vpop.permute.xlu1 %89 }
  0x82   :  { %v95_v1 = vpop.permute.xlu0 %94 }
  0x84   :  { %v85_v3 = vpop.permute.xlu1 %84 }
  0x86   :  { %v80_v10 = vpop.permute.xlu0 %79 }
  0x88   :  { %v75_v13 = vpop.permute.xlu1 %74 }
  0x8a   :  { %v70_v18 = vpop.permute.xlu0 %69 }
  0x8c   :  { %v65_v21 = vpop.permute.xlu1 %64 }
  0x8e   :  { %v350_v48 = vpop.permute.xlu0 %349 }
  0x90   :  { %v345_v50 = vpop.permute.xlu1 %344 }
  0x92   :  { %v340_v53 = vpop.permute.xlu0 %339 }
  0x94   :  { %v335_v55 = vpop.permute.xlu1 %334 }
  0xce   :  { %v1029_v58 = vpop.f32.mrf.mxu0 }
  0xcf   :  { %v199_v19 = vadd.f32 %v1029_v58, %v70_v18  ;;  %v330_v58 = vpop.permute.xlu0 %329 }
  0xd0   :  { %v193_v59 = vpop.f32.mrf.mxu0 }
  0xd1   :  { %v194_v22 = vadd.f32 %v193_v59, %v65_v21  ;;  %v233_v24 = vmax.f32 %v199_v19, 0.0 }
  0xd2   :  { %v1032_v61 = vpop.f32.mrf.mxu0 }
  0xd3   :  { %v209_v14 = vadd.f32 %v1032_v61, %v80_v10  ;;  %v232_v25 = vmax.f32 %v194_v22, 0.0 }
  0xd4   :  { %v203_v63 = vpop.f32.mrf.mxu0 }
  0xd5   :  { %v204_v16 = vadd.f32 %v203_v63, %v75_v13  ;;  %v235_v20 = vmax.f32 %v209_v14, 0.0 }
  0xd6   :  { %v1035_v0 = vpop.f32.mrf.mxu0 }
  0xd7   :  { %v219_v7 = vadd.f32 %v1035_v0, %v90_v62  ;;  %v234_v23 = vmax.f32 %v204_v16, 0.0  ;;  %v320_v0 = vpop.permute.xlu0 %319 }
  0xd8   :  { %v213_v2 = vpop.f32.mrf.mxu0 }
  0xd9   :  { %v214_v11 = vadd.f32 %v213_v2, %v85_v3  ;;  %v237_v15 = vmax.f32 %v219_v7, 0.0 }
  0xda   :  { %v1038_v4 = vpop.f32.mrf.mxu0 }
  0xdb   :  { %v229_v5 = vadd.f32 %v1038_v4, %v100_v60  ;;  %v236_v17 = vmax.f32 %v214_v11, 0.0  ;;  %v325_v60 = vpop.permute.xlu1 %324  ;;  %v310_v10 = vpop.permute.xlu0 %309 }
  0xdc   :  { %v223_v6 = vpop.f32.mrf.mxu0 }
  0xdd   :  { %v239_v8 = vmax.f32 %v229_v5, 0.0  ;;  %v224_v9 = vadd.f32 %v223_v6, %v95_v1 }
  0xdf   :  { %v238_v12 = vmax.f32 %v224_v9, 0.0  ;;  %1039 = vmatprep.subr.mxu1 %v239_v8  ;;  %v315_v5 = vpop.permute.xlu1 %314  ;;  %v300_v18 = vpop.permute.xlu0 %299 }
  0xe0   :  { %1040 = vmatpush3.msra.mxu1 %v239_v8 }
  0xe1   :  { %1041 = vmatprep.subr.mxu1 %v238_v12 }
  0xe2   :  { %1042 = vmatpush3.msra.mxu1 %v238_v12 }
  0xe3   :  { %1043 = vmatprep.subr.mxu1 %v237_v15  ;;  %v305_v13 = vpop.permute.xlu1 %304 }
  0xe4   :  { %1044 = vmatpush3.msra.mxu1 %v237_v15 }
  0xe5   :  { %1045 = vmatprep.subr.mxu1 %v236_v17 }
  0xe6   :  { %1046 = vmatpush3.msra.mxu1 %v236_v17 }
  0xe7   :  { %1047 = vmatprep.subr.mxu1 %v235_v20  ;;  %v295_v21 = vpop.permute.xlu1 %294 }
  0xe8   :  { %1048 = vmatpush3.msra.mxu1 %v235_v20 }
  0xe9   :  { %1049 = vmatprep.subr.mxu1 %v234_v23 }
  0xea   :  { %1050 = vmatpush3.msra.mxu1 %v234_v23 }
  0xeb   :  { %1051 = vmatprep.subr.mxu1 %v233_v24 }
  0xec   :  { %1052 = vmatpush3.msra.mxu1 %v233_v24 }
  0xed   :  { %1053 = vmatprep.subr.mxu1 %v232_v25 }
  0xee   :  { %1054 = vmatpush3.msra.mxu1 %v232_v25 }
  0xef   :  { %1056 = vmatmul.mubr.msk.f32.vlgmr.msra.gmra.mxu1 %vm352_vm1, %v241_v26  ;;  %v290_v26 = vpop.permute.xlu0 %289 }
  0xf0   :  { %1058 = vmatprep.mubr.msk.f32.mxu1 %vm352_vm1, %v242_v27 }
  0xf3   :  { %1059 = vmatmul.mubr.msk.f32.gmra.mxu1 %vm352_vm1, %v243_v28 }
  0xf4   :  { %1061 = vmatprep.mubr.msk.f32.mxu1 %vm352_vm1, %v244_v29  ;;  %v285_v29 = vpop.permute.xlu1 %284 }
  0xf7   :  { %1062 = vmatmul.mubr.msk.f32.gmra.mxu1 %vm352_vm1, %v245_v30 }
  0xf8   :  { %1064 = vmatprep.mubr.msk.f32.mxu1 %vm352_vm1, %v246_v31 }
  0xfb   :  { %1065 = vmatmul.mubr.msk.f32.gmra.mxu1 %vm352_vm1, %v247_v32 }
  0xfc   :  { %1067 = vmatprep.mubr.msk.f32.mxu1 %vm352_vm1, %v248_v33 }
  0xff   :  { %1068 = vmatmul.mubr.msk.f32.gmra.mxu1 %vm352_vm1, %v249_v34  ;;  %v280_v34 = vpop.permute.xlu0 %279 }
 0x100   :  { %1070 = vmatprep.mubr.msk.f32.mxu1 %vm352_vm1, %v250_v35 }
 0x103   :  { %1071 = vmatmul.mubr.msk.f32.gmra.mxu1 %vm352_vm1, %v251_v36 }
 0x104   :  { %1073 = vmatprep.mubr.msk.f32.mxu1 %vm352_vm1, %v252_v37  ;;  %v275_v37 = vpop.permute.xlu1 %274 }
 0x107   :  { %1074 = vmatmul.mubr.msk.f32.gmra.mxu1 %vm352_vm1, %v253_v38 }
 0x108   :  { %1076 = vmatprep.mubr.msk.f32.mxu1 %vm352_vm1, %v254_v39 }
 0x10b   :  { %1077 = vmatmul.mubr.msk.f32.gmra.mxu1 %vm352_vm1, %v255_v40 }
 0x1af   :  { %v1449_v42 = vpop.f32.mrf.mxu1 }
 0x1b0   :  { %v473_v35 = vadd.f32 %v1449_v42, %v280_v34  ;;  %v564_v42 = vld [vmem:[%s1510_s5 + $0x10] sm:$0xff] }
 0x1b1   :  { %v1451_v43 = vpop.f32.mrf.mxu1 }
 0x1b2   :  { %v468_v38 = vadd.f32 %v1451_v43, %v275_v37  ;;  %v547_v40 = vmax.f32 %v473_v35, 0.0  ;;  %v565_v43 = vld [vmem:[%s1510_s5 + $0x18] sm:$0xff] }
 0x1b3   :  { %v1453_v44 = vpop.f32.mrf.mxu1 }
 0x1b4   :  { %v483_v30 = vadd.f32 %v1453_v44, %v290_v26  ;;  %v546_v41 = vmax.f32 %v468_v38, 0.0  ;;  %v563_v44 = vld [vmem:[%s1510_s5 + $0x8] sm:$0xff] }
 0x1b5   :  { %v1455_v45 = vpop.f32.mrf.mxu1 }
 0x1b6   :  { %v478_v32 = vadd.f32 %v1455_v45, %v285_v29  ;;  %v549_v36 = vmax.f32 %v483_v30, 0.0  ;;  %v566_v45 = vld [vmem:[%s1510_s5 + $0x20] sm:$0xff] }
 0x1b7   :  { %v1063_v46 = vpop.f32.mrf.mxu1 }
 0x1b8   :  { %v493_v24 = vadd.f32 %v1063_v46, %v300_v18  ;;  %v548_v39 = vmax.f32 %v478_v32, 0.0  ;;  %v567_v46 = vld [vmem:[%s1510_s5 + $0x28] sm:$0xff] }
 0x1b9   :  { %v487_v47 = vpop.f32.mrf.mxu1  ;;  %v732_v18 = vld [vmem:[%s1511_s7 + $0x8] sm:$0xff] }
 0x1ba   :  { %v488_v27 = vadd.f32 %v487_v47, %v295_v21  ;;  %v551_v31 = vmax.f32 %v493_v24, 0.0  ;;  %v568_v47 = vld [vmem:[%s1510_s5 + $0x30] sm:$0xff] }
 0x1bb   :  { %v1066_v49 = vpop.f32.mrf.mxu1 }
 0x1bc   :  { %v503_v19 = vadd.f32 %v1066_v49, %v310_v10  ;;  %v550_v33 = vmax.f32 %v488_v27, 0.0  ;;  %v731_v49 = vld [vmem:[%s1511_s7] sm:$0xff] }
 0x1bd   :  { %v497_v51 = vpop.f32.mrf.mxu1  ;;  %1139 = vmatprep.mubr.msk.f32.mxu1 %vm352_vm1, %v731_v49 }
 0x1be   :  { %v498_v22 = vadd.f32 %v497_v51, %v305_v13  ;;  %v553_v25 = vmax.f32 %v503_v19, 0.0  ;;  %v733_v19 = vld [vmem:[%s1511_s7 + $0x10] sm:$0xff] }
 0x1bf   :  { %v1069_v52 = vpop.f32.mrf.mxu1 }
 0x1c0   :  { %v513_v14 = vadd.f32 %v1069_v52, %v320_v0  ;;  %v552_v28 = vmax.f32 %v498_v22, 0.0  ;;  %v616_v52 = vpop.permute.xlu0 %615 }
 0x1c1   :  { %v507_v54 = vpop.f32.mrf.mxu1 }
 0x1c2   :  { %v508_v16 = vadd.f32 %v507_v54, %v315_v5  ;;  %v555_v20 = vmax.f32 %v513_v14, 0.0  ;;  %v611_v54 = vpop.permute.xlu1 %610 }
 0x1c3   :  { %v1072_v56 = vpop.f32.mrf.mxu1 }
 0x1c4   :  { %v523_v8 = vadd.f32 %v1072_v56, %v330_v58  ;;  %v554_v23 = vmax.f32 %v508_v16, 0.0 }
 0x1c5   :  { %v517_v57 = vpop.f32.mrf.mxu1 }
 0x1c6   :  { %v518_v11 = vadd.f32 %v517_v57, %v325_v60  ;;  %v557_v15 = vmax.f32 %v523_v8, 0.0  ;;  %v606_v57 = vpop.permute.xlu0 %605 }
 0x1c7   :  { %v1075_v59 = vpop.f32.mrf.mxu1 }
 0x1c8   :  { %v533_v2 = vadd.f32 %v1075_v59, %v340_v53  ;;  %v556_v17 = vmax.f32 %v518_v11, 0.0  ;;  %v601_v59 = vpop.permute.xlu1 %600 }
 0x1c9   :  { %v527_v61 = vpop.f32.mrf.mxu1 }
 0x1ca   :  { %v528_v6 = vadd.f32 %v527_v61, %v335_v55  ;;  %v559_v9 = vmax.f32 %v533_v2, 0.0  ;;  %v596_v2 = vpop.permute.xlu0 %595 }
 0x1cb   :  { %v1078_v62 = vpop.f32.mrf.mxu1 }
 0x1cc   :  { %v543_v63 = vadd.f32 %v1078_v62, %v350_v48  ;;  %v558_v12 = vmax.f32 %v528_v6, 0.0  ;;  %v569_v48 = vld [vmem:[%s1510_s5 + $0x38] sm:$0xff]  ;;  %v591_v5 = vpop.permute.xlu1 %590 }
 0x1cd   :  { %v537_v1 = vpop.f32.mrf.mxu1 }
 0x1ce   :  { %v561_v3 = vmax.f32 %v543_v63, 0.0  ;;  %v538_v4 = vadd.f32 %v537_v1, %v345_v50  ;;  %v586_v10 = vpop.permute.xlu0 %585 }
 0x1d0   :  { %v560_v7 = vmax.f32 %v538_v4, 0.0  ;;  %1079 = vmatprep.subr.mxu0 %v561_v3  ;;  %v581_v13 = vpop.permute.xlu1 %580 }
 0x1d1   :  { %1080 = vmatpush3.msra.mxu0 %v561_v3 }
 0x1d2   :  { %1081 = vmatprep.subr.mxu0 %v560_v7  ;;  %v742_v21 = vpop.permute.xlu0 %741 }
 0x1d3   :  { %1082 = vmatpush3.msra.mxu0 %v560_v7 }
 0x1d4   :  { %1083 = vmatprep.subr.mxu0 %v559_v9  ;;  %v747_v22 = vpop.permute.xlu1 %746 }
 0x1d5   :  { %1084 = vmatpush3.msra.mxu0 %v559_v9 }
 0x1d6   :  { %1085 = vmatprep.subr.mxu0 %v558_v12 }
 0x1d7   :  { %1086 = vmatpush3.msra.mxu0 %v558_v12 }
 0x1d8   :  { %1087 = vmatprep.subr.mxu0 %v557_v15  ;;  %v757_v24 = vpop.permute.xlu1 %756 }
 0x1d9   :  { %1088 = vmatpush3.msra.mxu0 %v557_v15 }
 0x1da   :  { %1089 = vmatprep.subr.mxu0 %v556_v17 }
 0x1db   :  { %1090 = vmatpush3.msra.mxu0 %v556_v17 }
 0x1dc   :  { %1091 = vmatprep.subr.mxu0 %v555_v20  ;;  %v872_v34 = vpop.permute.xlu1 %871 }
 0x1dd   :  { %1092 = vmatpush3.msra.mxu0 %v555_v20  ;;  %v734_v20 = vld [vmem:[%s1511_s7 + $0x18] sm:$0xff] }
 0x1de   :  { %1093 = vmatprep.subr.mxu0 %v554_v23 }
 0x1df   :  { %1094 = vmatpush3.msra.mxu0 %v554_v23  ;;  %v752_v23 = vpop.permute.xlu0 %751 }
 0x1e0   :  { %1095 = vmatprep.subr.mxu0 %v553_v25 }
 0x1e1   :  { %1096 = vmatpush3.msra.mxu0 %v553_v25 }
 0x1e2   :  { %1097 = vmatprep.subr.mxu0 %v552_v28 }
 0x1e3   :  { %1098 = vmatpush3.msra.mxu0 %v552_v28  ;;  %v867_v29 = vpop.permute.xlu0 %866 }
 0x1e4   :  { %1099 = vmatprep.subr.mxu0 %v551_v31 }
 0x1e5   :  { %1100 = vmatpush3.msra.mxu0 %v551_v31 }
 0x1e6   :  { %1101 = vmatprep.subr.mxu0 %v550_v33 }
 0x1e7   :  { %1102 = vmatpush3.msra.mxu0 %v550_v33 }
 0x1e8   :  { %1103 = vmatprep.subr.mxu0 %v549_v36 }
 0x1e9   :  { %1104 = vmatpush3.msra.mxu0 %v549_v36 }
 0x1ea   :  { %1105 = vmatprep.subr.mxu0 %v548_v39 }
 0x1eb   :  { %1106 = vmatpush3.msra.mxu0 %v548_v39 }
 0x1ec   :  { %1107 = vmatprep.subr.mxu0 %v547_v40 }
 0x1ed   :  { %1108 = vmatpush3.msra.mxu0 %v547_v40 }
 0x1ee   :  { %1109 = vmatprep.subr.mxu0 %v546_v41 }
 0x1ef   :  { %1110 = vmatpush3.msra.mxu0 %v546_v41  ;;  %v877_v41 = vpop.permute.xlu0 %876 }
 0x1f0   :  { %1112 = vmatmul.mubr.f32.vlgmr.msra.gmra.mxu0 %v563_v44 }
 0x1f1   :  { %1114 = vmatprep.mubr.f32.mxu0 %v564_v42 }
 0x1f4   :  { %1115 = vmatmul.mubr.f32.gmra.mxu0 %v565_v43  ;;  %v882_v43 = vpop.permute.xlu1 %881 }
 0x1f5   :  { %1117 = vmatprep.mubr.f32.mxu0 %v566_v45 }
 0x1f8   :  { %1118 = vmatmul.mubr.f32.gmra.mxu0 %v567_v46 }
 0x1f9   :  { %1120 = vmatprep.mubr.f32.mxu0 %v568_v47  ;;  %v903_v47 = vlaneseq }
 0x1fc   :  { %1121 = vmatmul.mubr.f32.gmra.mxu0 %v569_v48 }
 0x2b0   :  { %v1113_v50 = vpop.f32.mrf.mxu0 }
 0x2b1   :  { %v690_v11 = vadd.f32 %v1113_v50, %v586_v10  ;;  %v904_v50 = vshrl.u32 %v903_v47, 7 }
 0x2b2   :  { %v684_v51 = vpop.f32.mrf.mxu0 }
 0x2b3   :  { %v685_v14 = vadd.f32 %v684_v51, %v581_v13  ;;  %v724_v16 = vmax.f32 %v690_v11, 0.0 }
 0x2b4   :  { %v1116_v53 = vpop.f32.mrf.mxu0 }
 0x2b5   :  { %v700_v6 = vadd.f32 %v1116_v53, %v596_v2  ;;  %v723_v17 = vmax.f32 %v685_v14, 0.0  ;;  %v905_v53 = vsub.s32 0, %v904_v50 }
 0x2b6   :  { %v694_v55 = vpop.f32.mrf.mxu0 }
 0x2b7   :  { %v695_v8 = vadd.f32 %v694_v55, %v591_v5  ;;  %v726_v12 = vmax.f32 %v700_v6, 0.0  ;;  %v901_v55 = vpop.permute.xlu0 %900 }
 0x2b8   :  { %v1119_v56 = vpop.f32.mrf.mxu0 }
 0x2b9   :  { %v710_v63 = vadd.f32 %v1119_v56, %v606_v57  ;;  %v725_v15 = vmax.f32 %v695_v8, 0.0  ;;  %v906_v57 = vrot.slane %v901_v55, %v905_v53 }
 0x2ba   :  { %v704_v58 = vpop.f32.mrf.mxu0 }
 0x2bb   :  { %v705_v3 = vadd.f32 %v704_v58, %v601_v59  ;;  %v728_v7 = vmax.f32 %v710_v63, 0.0 }
 0x2bc   :  { %v1122_v60 = vpop.f32.mrf.mxu0 }
 0x2bd   :  { %v720_v61 = vadd.f32 %v1122_v60, %v616_v52  ;;  %v727_v9 = vmax.f32 %v705_v3, 0.0 }
 0x2be   :  { %v714_v62 = vpop.f32.mrf.mxu0 }
 0x2bf   :  { %v730_v0 = vmax.f32 %v720_v61, 0.0  ;;  %v715_v1 = vadd.f32 %v714_v62, %v611_v54 }
 0x2c1   :  { %v729_v4 = vmax.f32 %v715_v1, 0.0  ;;  %1123 = vmatprep.subr.mxu1 %v730_v0 }
 0x2c2   :  { %1124 = vmatpush3.msra.mxu1 %v730_v0 }
 0x2c3   :  { %1125 = vmatprep.subr.mxu1 %v729_v4 }
 0x2c4   :  { %1126 = vmatpush3.msra.mxu1 %v729_v4 }
 0x2c5   :  { %1127 = vmatprep.subr.mxu1 %v728_v7 }
 0x2c6   :  { %1128 = vmatpush3.msra.mxu1 %v728_v7 }
 0x2c7   :  { %1129 = vmatprep.subr.mxu1 %v727_v9 }
 0x2c8   :  { %1130 = vmatpush3.msra.mxu1 %v727_v9 }
 0x2c9   :  { %1131 = vmatprep.subr.mxu1 %v726_v12 }
 0x2ca   :  { %1132 = vmatpush3.msra.mxu1 %v726_v12 }
 0x2cb   :  { %1133 = vmatprep.subr.mxu1 %v725_v15 }
 0x2cc   :  { %1134 = vmatpush3.msra.mxu1 %v725_v15 }
 0x2cd   :  { %1135 = vmatprep.subr.mxu1 %v724_v16 }
 0x2ce   :  { %1136 = vmatpush3.msra.mxu1 %v724_v16 }
 0x2cf   :  { %1137 = vmatprep.subr.mxu1 %v723_v17 }
 0x2d0   :  { %1138 = vmatpush3.msra.mxu1 %v723_v17 }
 0x2d1   :  { %1140 = vmatmul.mubr.msk.f32.vlgmr.msra.gmra.mxu1 %vm352_vm1, %v732_v18 }
 0x2d2   :  { %1142 = vmatprep.mubr.msk.f32.mxu1 %vm352_vm1, %v733_v19 }
 0x2d5   :  { %1143 = vmatmul.mubr.msk.f32.gmra.mxu1 %vm352_vm1, %v734_v20 }
 0x391   :  { %v1141_v25 = vpop.f32.mrf.mxu1 }
 0x392   :  { %v843_v26 = vadd.f32 %v1141_v25, %v747_v22 }
 0x393   :  { %v837_v27 = vpop.f32.mrf.mxu1 }
 0x394   :  { %v838_v28 = vadd.f32 %v837_v27, %v742_v21  ;;  %v857_v31 = vmax.f32 %v843_v26, 0.0 }
 0x395   :  { %v1144_v30 = vpop.f32.mrf.mxu1 }
 0x396   :  { %v856_v32 = vmax.f32 %v838_v28, 0.0  ;;  %v853_v33 = vadd.f32 %v1144_v30, %v757_v24  ;;  %v885_v38 = vmul.f32 %v872_v34, %v857_v31 }
 0x397   :  { %v847_v35 = vpop.f32.mrf.mxu1 }
 0x398   :  { %v884_v36 = vmul.f32 %v867_v29, %v856_v32  ;;  %v848_v37 = vadd.f32 %v847_v35, %v752_v23  ;;  %v859_v39 = vmax.f32 %v853_v33, 0.0 }
 0x39a   :  { %v858_v40 = vmax.f32 %v848_v37, 0.0  ;;  %v888_v44 = vadd.f32 %v885_v38, %v884_v36  ;;  %v887_v45 = vmul.f32 %v882_v43, %v859_v39 }
 0x39c   :  { %v886_v42 = vmul.f32 %v877_v41, %v858_v40 }
 0x39e   :  { %v889_v46 = vadd.f32 %v888_v44, %v886_v42 }
 0x3a0   :  { %v890_v48 = vadd.f32 %v889_v46, %v887_v45 }
 0x3a2   :  { %v891_v49 = vrot.slane %v890_v48, 4 }
 0x3a4   :  { %v892_v51 = vadd.f32 %v891_v49, %v890_v48 }
 0x3a6   :  { %v893_v52 = vrot.slane %v892_v51, 2 }
 0x3a8   :  { %v894_v54 = vadd.f32 %v893_v52, %v892_v51 }
 0x3aa   :  { %v895_v56 = vrot.slane %v894_v54, 1 }
 0x3ac   :  { %v896_v58 = vadd.f32 %v895_v56, %v894_v54 }
 0x3ae   :  { %v907_v59 = vadd.f32 %v906_v57, %v896_v58 }
 0x3b0   :  { %908 = vst [vmem:[%s1512_s11] sm:$0x1] %v907_v59 }

</bundles_post_ra>
